<compile_context>
chip_gen: v7x
topology: tpu7x:2x2x1
jax: 0.10.0
libtpu: 0.0.40
codegen_flags: <defaults>
</compile_context>

<pallas_src>
import jax
import jax.numpy as jnp
import numpy as np
from jax.experimental import pallas as pl
from jax.experimental.pallas import tpu as pltpu


def _identity_kernel(x_ref, o_ref):
    # Trivial elementwise pass-through (harness smoke test only).
    o_ref[...] = x_ref[...]


def _round_up(v, m):
    return ((v + m - 1) // m) * m


def _identity_pallas(x):
    """Identity copy through VMEM.

    Tiling: tiles up to 512 x 1024 f32 (≈ 2 MiB/block — comfortably inside the
    scoped VMEM budget even double-buffered and under v7x's tighter 64 MiB
    physical cap), last dim kept a multiple of 128 so stores are unmasked
    lane-dense vst.  Grid uses pl.cdiv so non-multiple shapes are not silently
    truncated.  Both grid axes are independent -> "parallel" semantics.
    """
    R, C = x.shape
    tr = min(_round_up(R, 8), 512)
    tc = min(_round_up(C, 128), 1024)
    grid = (pl.cdiv(R, tr), pl.cdiv(C, tc))
    return pl.pallas_call(
        _identity_kernel,
        out_shape=jax.ShapeDtypeStruct((R, C), x.dtype),
        grid_spec=pltpu.PrefetchScalarGridSpec(
            num_scalar_prefetch=0,
            grid=grid,
            in_specs=[pl.BlockSpec((tr, tc), lambda i, j: (i, j))],
            out_specs=pl.BlockSpec((tr, tc), lambda i, j: (i, j)),
        ),
        # Pure pass-through: reuse the input HBM buffer as the output buffer
        # instead of allocating + DMA-writing a second one.
        input_output_aliases={0: 0},
        compiler_params=pltpu.CompilerParams(
            dimension_semantics=("parallel", "parallel"),
        ),
    )(x)


class TransformerDecoder:
    """JAX/Pallas counterpart of the (empty) PyTorch TransformerDecoder."""

    def __init__(self):
        # Reference __init__ defines no parameters.
        pass

    def forward(self):
        # Reference forward(): pass -> consumes no inputs, returns None.
        # True no-op: no placeholder kernel launch, no block_until_ready,
        # zero device/host overhead.
        return None

    __call__ = forward


if __name__ == "__main__":
    # Module semantics check: forward() takes no arguments and returns None.
    model = TransformerDecoder()
    out = model()
    assert out is None

    # Harness smoke test for the Pallas path (single launch at a small,
    # lane-dense shape).  This input is NOT consumed by the module's forward
    # (which takes no inputs); it only exercises the identity kernel once.
    key = jax.random.PRNGKey(0)
    x = jax.random.normal(key, (128, 256), dtype=jnp.float32)
    # Host copy of the expected values BEFORE the call, since the input buffer
    # is aliased/donated to the output.
    expected = np.asarray(jax.device_get(x))

    y = _identity_pallas(x)
    jax.block_until_ready(y)

    assert np.allclose(np.asarray(jax.device_get(y)), expected)
    print("KERNEL_OK")
</pallas_src>

<mosaic_0001>
module attributes {stable_mosaic.version = 11 : i64} {
  func.func @_identity_kernel(%arg0: i32, %arg1: i32, %arg2: memref<128x256xf32, #tpu.memory_space<vmem>>, %arg3: memref<128x256xf32, #tpu.memory_space<vmem>>) attributes {dimension_semantics = [#tpu.dimension_semantics<parallel>, #tpu.dimension_semantics<parallel>], iteration_bounds = array<i64: 1, 1>, scalar_prefetch = 0 : i64, scratch_operands = 0 : i64, tpu.core_type = #tpu.core_type<tc>, window_params = [{transform_indices = @transform_0, window_bounds = array<i64: 128, 256>}, {transform_indices = @transform_1, window_bounds = array<i64: 128, 256>}]} {
    %c0 = arith.constant 0 : index
    %c0_0 = arith.constant 0 : index
    %0 = vector.load %arg2[%c0, %c0_0] : memref<128x256xf32, #tpu.memory_space<vmem>>, vector<128x256xf32>
    %c0_1 = arith.constant 0 : index
    %c0_2 = arith.constant 0 : index
    %1 = vector.load %arg3[%c0_1, %c0_2] : memref<128x256xf32, #tpu.memory_space<vmem>>, vector<128x256xf32>
    tpu.vector_store %arg3[%c0_1, %c0_2], %0 {strides = array<i32>} : memref<128x256xf32, #tpu.memory_space<vmem>>, vector<128x256xf32>,
    return
  }
  func.func @transform_0(%arg0: i32, %arg1: i32) -> (i32, i32) {
    %c0_i32 = arith.constant 0 : i32
    return %arg0, %arg1 : i32, i32
  }
  func.func @transform_1(%arg0: i32, %arg1: i32) -> (i32, i32) {
    %c0_i32 = arith.constant 0 : i32
    return %arg0, %arg1 : i32, i32
  }
}

</mosaic_0001>

<bundles_post_ra>
// kernel: tpu_custom_call.1
= control target key start
LH: loop header
LB: loop body
LE: loop exit
PB: predicated region body
PF: predicated region fallthrough
CT: control target
= control target key end

     0   :  { %6 = vsyncpa [#allocation3], 0  ;;  %s200_s0 = inlined_call_operand.hbm [shape: f32[128,256], index: 0, kind: input, shape index: {}, may-alias: {0,1}]   ;;  %s201_s1 = inlined_call_operand.hbm [shape: f32[128,256], index: 1, kind: output, shape index: {}, may-alias: {0,1}]  }
   0x1   :  { %7 = vsyncpa [#allocation4], 0  ;;  %s156_s6 = smov [#allocation2]   ;;  %s108_s10 = scalar_lea.hbm %s200_s0, 4096 }
   0x2   :  { %s13_s7 = sshll.u32 %s156_s6, 4  ;;  %p109_p0 = scmp.ne.s32.totalorder %s200_s0, %s108_s10  ;;  %s14_s7 = int_to_ptr.vmem [resolvable:$true] %s13_s7 }
   0x3   :  { %p112_p1 = scmp.lt.u32.totalorder %s108_s10, %s200_s0 }
   0x5   :  { %p114_p2 = pnand %p112_p1, %p109_p0 }
   0x7   :  { %117 = shalt.err (!%p114_p2)
}
   0x8   :  { %s118_s15 = scalar_lea.vmem %s14_s7, 4096  ;;  %p123_p4 = scmp.lt.s32.totalorder %s14_s7, %s14_s7 }
   0x9   :  { %p119_p3 = scmp.ne.s32.totalorder %s14_s7, %s118_s15  ;;  %p124_p5 = scmp.lt.s32.totalorder %s118_s15, %s118_s15 }
   0xb   :  { %p125_p6 = por %p124_p5, %p123_p4 }
   0xd   :  { %p126_p7 = pnand %p125_p6, %p119_p3 }
   0xf   :  { %129 = shalt.err (!%p126_p7)
}
  0x10   :  { %s157_s16 = smov 256   ;;  %s158_s17 = smov 16  }
  0x11   :  { %19 = dma.hbm_to_vmem [thread:$0]  %s200_s0, 4096, %s14_s7, [#allocation3], %s157_s16, %s157_s16, %s158_s17  }
  0x12   :  { %152 = dma.done.wait [#allocation3], 4096  }
  0x13   :  { %153 = vsyncadd [#allocation3], 4294963200  ;;  %v23_v0 = vld [vmem:[#allocation2] sm:$0xff]  ;;  %v24_v1 = vld [vmem:[#allocation2 + $0x8] sm:$0xff]  ;;  %s159_s0 = smov [#allocation5]  }
  0x14   :  { %v25_v2 = vld [vmem:[#allocation2 + $0x10] sm:$0xff]  ;;  %55 = vst [vmem:[#allocation5] sm:$0xff] %v23_v0  ;;  %56 = vst [vmem:[#allocation5 + $0x8] sm:$0xff] %v24_v1  ;;  %v26_v3 = vld [vmem:[#allocation2 + $0x18] sm:$0xff]  ;;  %s92_s20 = sshll.u32 %s159_s0, 4  ;;  %s93_s20 = int_to_ptr.vmem [resolvable:$true] %s92_s20 }
  0x15   :  { %57 = vst [vmem:[#allocation5 + $0x10] sm:$0xff] %v25_v2  ;;  %v27_v4 = vld [vmem:[#allocation2 + $0x20] sm:$0xff]  ;;  %v28_v5 = vld [vmem:[#allocation2 + $0x28] sm:$0xff]  ;;  %58 = vst [vmem:[#allocation5 + $0x18] sm:$0xff] %v26_v3  ;;  %s130_s21 = scalar_lea.vmem %s93_s20, 4096  ;;  %p135_p9 = scmp.lt.s32.totalorder %s93_s20, %s93_s20 }
  0x16   :  { %59 = vst [vmem:[#allocation5 + $0x20] sm:$0xff] %v27_v4  ;;  %60 = vst [vmem:[#allocation5 + $0x28] sm:$0xff] %v28_v5  ;;  %v29_v6 = vld [vmem:[#allocation2 + $0x30] sm:$0xff]  ;;  %v30_v7 = vld [vmem:[#allocation2 + $0x38] sm:$0xff]  ;;  %p131_p8 = scmp.ne.s32.totalorder %s93_s20, %s130_s21  ;;  %p136_p10 = scmp.lt.s32.totalorder %s130_s21, %s130_s21 }
  0x17   :  { %v31_v8 = vld [vmem:[#allocation2 + $0x40] sm:$0xff]  ;;  %61 = vst [vmem:[#allocation5 + $0x30] sm:$0xff] %v29_v6  ;;  %62 = vst [vmem:[#allocation5 + $0x38] sm:$0xff] %v30_v7  ;;  %v32_v9 = vld [vmem:[#allocation2 + $0x48] sm:$0xff] }
  0x18   :  { %63 = vst [vmem:[#allocation5 + $0x40] sm:$0xff] %v31_v8  ;;  %v33_v10 = vld [vmem:[#allocation2 + $0x50] sm:$0xff]  ;;  %v34_v11 = vld [vmem:[#allocation2 + $0x58] sm:$0xff]  ;;  %64 = vst [vmem:[#allocation5 + $0x48] sm:$0xff] %v32_v9  ;;  %p137_p11 = por %p136_p10, %p135_p9 }
  0x19   :  { %65 = vst [vmem:[#allocation5 + $0x50] sm:$0xff] %v33_v10  ;;  %66 = vst [vmem:[#allocation5 + $0x58] sm:$0xff] %v34_v11  ;;  %v35_v12 = vld [vmem:[#allocation2 + $0x60] sm:$0xff]  ;;  %v36_v13 = vld [vmem:[#allocation2 + $0x68] sm:$0xff] }
  0x1a   :  { %v37_v14 = vld [vmem:[#allocation2 + $0x70] sm:$0xff]  ;;  %67 = vst [vmem:[#allocation5 + $0x60] sm:$0xff] %v35_v12  ;;  %68 = vst [vmem:[#allocation5 + $0x68] sm:$0xff] %v36_v13  ;;  %v38_v15 = vld [vmem:[#allocation2 + $0x78] sm:$0xff]  ;;  %p138_p12 = pnand %p137_p11, %p131_p8 }
  0x1b   :  { %69 = vst [vmem:[#allocation5 + $0x70] sm:$0xff] %v37_v14  ;;  %v39_v16 = vld [vmem:[#allocation2 + $0x80] sm:$0xff]  ;;  %v40_v17 = vld [vmem:[#allocation2 + $0x88] sm:$0xff]  ;;  %70 = vst [vmem:[#allocation5 + $0x78] sm:$0xff] %v38_v15 }
  0x1c   :  { %71 = vst [vmem:[#allocation5 + $0x80] sm:$0xff] %v39_v16  ;;  %72 = vst [vmem:[#allocation5 + $0x88] sm:$0xff] %v40_v17  ;;  %v41_v18 = vld [vmem:[#allocation2 + $0x90] sm:$0xff]  ;;  %v42_v19 = vld [vmem:[#allocation2 + $0x98] sm:$0xff] }
  0x1d   :  { %v43_v20 = vld [vmem:[#allocation2 + $0xa0] sm:$0xff]  ;;  %73 = vst [vmem:[#allocation5 + $0x90] sm:$0xff] %v41_v18  ;;  %74 = vst [vmem:[#allocation5 + $0x98] sm:$0xff] %v42_v19  ;;  %v44_v21 = vld [vmem:[#allocation2 + $0xa8] sm:$0xff] }
  0x1e   :  { %75 = vst [vmem:[#allocation5 + $0xa0] sm:$0xff] %v43_v20  ;;  %v45_v22 = vld [vmem:[#allocation2 + $0xb0] sm:$0xff]  ;;  %v46_v23 = vld [vmem:[#allocation2 + $0xb8] sm:$0xff]  ;;  %76 = vst [vmem:[#allocation5 + $0xa8] sm:$0xff] %v44_v21 }
  0x1f   :  { %77 = vst [vmem:[#allocation5 + $0xb0] sm:$0xff] %v45_v22  ;;  %78 = vst [vmem:[#allocation5 + $0xb8] sm:$0xff] %v46_v23  ;;  %v47_v24 = vld [vmem:[#allocation2 + $0xc0] sm:$0xff]  ;;  %v48_v25 = vld [vmem:[#allocation2 + $0xc8] sm:$0xff] }
  0x20   :  { %v49_v26 = vld [vmem:[#allocation2 + $0xd0] sm:$0xff]  ;;  %79 = vst [vmem:[#allocation5 + $0xc0] sm:$0xff] %v47_v24  ;;  %80 = vst [vmem:[#allocation5 + $0xc8] sm:$0xff] %v48_v25  ;;  %v50_v27 = vld [vmem:[#allocation2 + $0xd8] sm:$0xff] }
  0x21   :  { %81 = vst [vmem:[#allocation5 + $0xd0] sm:$0xff] %v49_v26  ;;  %v51_v28 = vld [vmem:[#allocation2 + $0xe0] sm:$0xff]  ;;  %v52_v29 = vld [vmem:[#allocation2 + $0xe8] sm:$0xff]  ;;  %82 = vst [vmem:[#allocation5 + $0xd8] sm:$0xff] %v50_v27 }
  0x22   :  { %83 = vst [vmem:[#allocation5 + $0xe0] sm:$0xff] %v51_v28  ;;  %84 = vst [vmem:[#allocation5 + $0xe8] sm:$0xff] %v52_v29  ;;  %v53_v30 = vld [vmem:[#allocation2 + $0xf0] sm:$0xff]  ;;  %v54_v31 = vld [vmem:[#allocation2 + $0xf8] sm:$0xff] }
  0x23   :  { %85 = vst [vmem:[#allocation5 + $0xf0] sm:$0xff] %v53_v30  ;;  %86 = vst [vmem:[#allocation5 + $0xf8] sm:$0xff] %v54_v31 }
  0x24   :  { %141 = shalt.err (!%p138_p12)
}
  0x25   :  { %s142_s24 = scalar_lea.hbm %s201_s1, 4096 }
  0x26   :  { %p143_p13 = scmp.ne.s32.totalorder %s201_s1, %s142_s24  ;;  %p146_p0 = scmp.lt.u32.totalorder %s142_s24, %s201_s1 }
  0x28   :  { %p148_p1 = pnand %p146_p0, %p143_p13 }
  0x2a   :  { %151 = shalt.err (!%p148_p1)
}
  0x2b   :  { %98 = dma.vmem_to_hbm [thread:$0]  %s93_s20, 4096, %s201_s1, [#allocation4], %s157_s16, %s157_s16, %s158_s17  }
  0x2c   :  { %154 = dma.done.wait [#allocation4], 4096  }
  0x2d   :  { %155 = vsyncadd [#allocation4], 4294963200 }
  0x2e   :  { %102 = vsyncpa [#allocation3], 1 }
  0x2f   :  { %103 = vsyncpa [#allocation4], 1 }

</bundles_post_ra>
